<compile_context>
chip_gen: v7x
topology: tpu7x:2x2x1
jax: 0.10.0
libtpu: 0.0.40
codegen_flags: <defaults>
</compile_context>

<pallas_src>
import jax
import jax.numpy as jnp
from jax.experimental import pallas as pl
from jax.experimental.pallas import tpu as pltpu

HIDDEN = 128


def _round_up(x, m):
    return ((x + m - 1) // m) * m


def critic_kernel(s_ref, a_ref, w1s_ref, w1a_ref, b1_ref, w2_ref, b2_ref,
                  w3_ref, b3_ref, o_ref):
    # Layer 1: fused-concat first linear -> two MXU matmuls (bf16 in, f32 acc).
    h1 = (jnp.dot(s_ref[...], w1s_ref[...], preferred_element_type=jnp.float32)
          + jnp.dot(a_ref[...], w1a_ref[...], preferred_element_type=jnp.float32)
          + b1_ref[...])
    h1 = jnp.maximum(h1, 0.0).astype(w2_ref.dtype)

    # Layer 2: [tb,128] x [128,128] MXU matmul, f32 accumulation.
    h2 = jnp.dot(h1, w2_ref[...], preferred_element_type=jnp.float32) + b2_ref[...]
    h2 = jnp.maximum(h2, 0.0)

    # Layer 3 (out_features = 1): VPU multiply + lane reduction instead of a
    # degenerate [128,1] MXU matmul. b3 is an SMEM scalar.
    q = jnp.sum(h2 * w3_ref[...], axis=-1, keepdims=True) + b3_ref[0, 0]
    o_ref[...] = q.astype(o_ref.dtype)


def critic_forward(state, action, params, *, tile_b=256):
    """state: [B, S] f32, action: [B, A] f32; returns [B, 1] f32 Q-values."""
    w1s, w1a, b1, w2, b2, w3, b3 = params
    B, S = state.shape
    A = action.shape[1]
    H = w2.shape[0]

    # Batch tile: multiple of 8 sublanes; pad B up to a multiple of the tile.
    tb = min(tile_b, _round_up(B, 8))
    Bp = _round_up(B, tb)

    s = state.astype(jnp.bfloat16)
    a = action.astype(jnp.bfloat16)
    if Bp != B:
        pad = ((0, Bp - B), (0, 0))
        s = jnp.pad(s, pad)
        a = jnp.pad(a, pad)

    out = pl.pallas_call(
        critic_kernel,
        out_shape=jax.ShapeDtypeStruct((Bp, 1), jnp.float32),
        grid=(Bp // tb,),
        in_specs=[
            pl.BlockSpec((tb, S), lambda i: (i, 0)),      # state tile
            pl.BlockSpec((tb, A), lambda i: (i, 0)),      # action tile
            pl.BlockSpec((S, H), lambda i: (0, 0)),       # W1s (resident)
            pl.BlockSpec((A, H), lambda i: (0, 0)),       # W1a (resident)
            pl.BlockSpec((1, H), lambda i: (0, 0)),       # b1
            pl.BlockSpec((H, H), lambda i: (0, 0)),       # W2 (resident)
            pl.BlockSpec((1, H), lambda i: (0, 0)),       # b2
            pl.BlockSpec((1, H), lambda i: (0, 0)),       # w3 (row vector)
            pl.BlockSpec(memory_space=pltpu.MemorySpace.SMEM),  # b3 scalar
        ],
        out_specs=pl.BlockSpec((tb, 1), lambda i: (i, 0)),
        compiler_params=pltpu.CompilerParams(
            dimension_semantics=("parallel",)),
    )(s, a, w1s, w1a, b1, w2, b2, w3, b3)
    return out[:B]


def init_params(key, state_dim, action_dim, hidden=HIDDEN):
    """PyTorch nn.Linear-style init (uniform +/- 1/sqrt(fan_in)).

    Weight layout is [in, out] (pre-transposed vs torch). W1 is split into
    W1s/W1a so the concat can be fused; matmul weights are stored bf16,
    the final row-vector weight and biases stay f32.
    """
    d_in = state_dim + action_dim
    bound1 = 1.0 / jnp.sqrt(jnp.float32(d_in))
    bound2 = 1.0 / jnp.sqrt(jnp.float32(hidden))

    k1s, k1a, kb1, k2, kb2, k3, kb3 = jax.random.split(key, 7)
    w1s = jax.random.uniform(k1s, (state_dim, hidden), jnp.float32, -bound1, bound1)
    w1a = jax.random.uniform(k1a, (action_dim, hidden), jnp.float32, -bound1, bound1)
    b1 = jax.random.uniform(kb1, (1, hidden), jnp.float32, -bound1, bound1)
    w2 = jax.random.uniform(k2, (hidden, hidden), jnp.float32, -bound2, bound2)
    b2 = jax.random.uniform(kb2, (1, hidden), jnp.float32, -bound2, bound2)
    w3 = jax.random.uniform(k3, (1, hidden), jnp.float32, -bound2, bound2)
    b3 = jax.random.uniform(kb3, (1, 1), jnp.float32, -bound2, bound2)

    return (w1s.astype(jnp.bfloat16), w1a.astype(jnp.bfloat16), b1,
            w2.astype(jnp.bfloat16), b2, w3, b3)


def critic_reference(state, action, params):
    """Pure-JAX reference matching the kernel's bf16-operand / f32-accum math."""
    w1s, w1a, b1, w2, b2, w3, b3 = params
    s = state.astype(jnp.bfloat16)
    a = action.astype(jnp.bfloat16)
    h1 = (jnp.dot(s, w1s, preferred_element_type=jnp.float32)
          + jnp.dot(a, w1a, preferred_element_type=jnp.float32) + b1)
    h1 = jnp.maximum(h1, 0.0).astype(jnp.bfloat16)
    h2 = jnp.dot(h1, w2, preferred_element_type=jnp.float32) + b2
    h2 = jnp.maximum(h2, 0.0)
    return jnp.sum(h2 * w3, axis=-1, keepdims=True) + b3[0, 0]


def critic_reference_f32(state, action, params):
    """Full-f32 reference (PyTorch semantics) for a loose sanity check."""
    w1s, w1a, b1, w2, b2, w3, b3 = params
    w1 = jnp.concatenate([w1s.astype(jnp.float32), w1a.astype(jnp.float32)], axis=0)
    x = jnp.concatenate([state, action], axis=-1)
    h1 = jnp.maximum(x @ w1 + b1, 0.0)
    h2 = jnp.maximum(h1 @ w2.astype(jnp.float32) + b2, 0.0)
    return h2 @ w3.T + b3[0, 0]


if __name__ == "__main__":
    key = jax.random.PRNGKey(0)
    k_state, k_action, k_params = jax.random.split(key, 3)

    # Small shapes; batch chosen not divisible by the tile to exercise
    # the pad-and-slice path and a 2-step batch grid.
    batch, state_dim, action_dim = 200, 24, 8
    state = jax.random.normal(k_state, (batch, state_dim), jnp.float32)
    action = jax.random.normal(k_action, (batch, action_dim), jnp.float32)
    params = init_params(k_params, state_dim, action_dim)

    out = critic_forward(state, action, params, tile_b=128)
    out = jax.block_until_ready(out)

    ref = critic_reference(state, action, params)
    assert out.shape == (batch, 1), out.shape
    assert jnp.allclose(out, ref, atol=2e-3, rtol=2e-3), float(
        jnp.max(jnp.abs(out - ref)))

    # Loose sanity check vs full-f32 (original PyTorch-precision) math.
    ref32 = critic_reference_f32(state, action, params)
    assert jnp.allclose(out, ref32, atol=1e-1, rtol=1e-1), float(
        jnp.max(jnp.abs(out - ref32)))

    print("KERNEL_OK")
</pallas_src>

<mosaic_0001>
module attributes {stable_mosaic.version = 11 : i64} {
  func.func @critic_kernel(%arg0: i32, %arg1: memref<128x24xbf16, #tpu.memory_space<vmem>>, %arg2: memref<128x8xbf16, #tpu.memory_space<vmem>>, %arg3: memref<24x128xbf16, #tpu.memory_space<vmem>>, %arg4: memref<8x128xbf16, #tpu.memory_space<vmem>>, %arg5: memref<1x128xf32, #tpu.memory_space<vmem>>, %arg6: memref<128x128xbf16, #tpu.memory_space<vmem>>, %arg7: memref<1x128xf32, #tpu.memory_space<vmem>>, %arg8: memref<1x128xf32, #tpu.memory_space<vmem>>, %arg9: memref<1x1xf32, #tpu.memory_space<smem>>, %arg10: memref<128x1xf32, #tpu.memory_space<vmem>>) attributes {dimension_semantics = [#tpu.dimension_semantics<parallel>], iteration_bounds = array<i64: 2>, scalar_prefetch = 0 : i64, scratch_operands = 0 : i64, tpu.core_type = #tpu.core_type<tc>, window_params = [{transform_indices = @transform_0, window_bounds = array<i64: 128, 24>}, {transform_indices = @transform_1, window_bounds = array<i64: 128, 8>}, {pipeline_mode = #tpu.pipeline_mode<synchronous>, transform_indices = @transform_2, window_bounds = array<i64: 24, 128>}, {pipeline_mode = #tpu.pipeline_mode<synchronous>, transform_indices = @transform_3, window_bounds = array<i64: 8, 128>}, {pipeline_mode = #tpu.pipeline_mode<synchronous>, transform_indices = @transform_4, window_bounds = array<i64: 1, 128>}, {pipeline_mode = #tpu.pipeline_mode<synchronous>, transform_indices = @transform_5, window_bounds = array<i64: 128, 128>}, {pipeline_mode = #tpu.pipeline_mode<synchronous>, transform_indices = @transform_6, window_bounds = array<i64: 1, 128>}, {pipeline_mode = #tpu.pipeline_mode<synchronous>, transform_indices = @transform_7, window_bounds = array<i64: 1, 128>}, {transform_indices = @transform_8, window_bounds = array<i64: 1, 1>}, {transform_indices = @transform_9, window_bounds = array<i64: 128, 1>}]} {
    %c0 = arith.constant 0 : index
    %c0_0 = arith.constant 0 : index
    %0 = vector.load %arg1[%c0, %c0_0] : memref<128x24xbf16, #tpu.memory_space<vmem>>, vector<128x24xbf16>
    %c0_1 = arith.constant 0 : index
    %c0_2 = arith.constant 0 : index
    %1 = vector.load %arg3[%c0_1, %c0_2] : memref<24x128xbf16, #tpu.memory_space<vmem>>, vector<24x128xbf16>
    %cst = arith.constant dense<0.000000e+00> : vector<128x128xf32>
    %2 = tpu.matmul %0, %1, %cst {dimension_numbers = #tpu.dot_dimension_numbers<[1], [0], [0], [1], [0, 0, 1, 1], [], []>} : vector<128x24xbf16>, vector<24x128xbf16>, vector<128x128xf32> -> vector<128x128xf32>
    %c0_3 = arith.constant 0 : index
    %c0_4 = arith.constant 0 : index
    %3 = vector.load %arg2[%c0_3, %c0_4] : memref<128x8xbf16, #tpu.memory_space<vmem>>, vector<128x8xbf16>
    %c0_5 = arith.constant 0 : index
    %c0_6 = arith.constant 0 : index
    %4 = vector.load %arg4[%c0_5, %c0_6] : memref<8x128xbf16, #tpu.memory_space<vmem>>, vector<8x128xbf16>
    %cst_7 = arith.constant dense<0.000000e+00> : vector<128x128xf32>
    %5 = tpu.matmul %3, %4, %cst_7 {dimension_numbers = #tpu.dot_dimension_numbers<[1], [0], [0], [1], [0, 0, 1, 1], [], []>} : vector<128x8xbf16>, vector<8x128xbf16>, vector<128x128xf32> -> vector<128x128xf32>
    %6 = arith.addf %2, %5 : vector<128x128xf32>
    %c0_8 = arith.constant 0 : index
    %c0_9 = arith.constant 0 : index
    %7 = vector.load %arg5[%c0_8, %c0_9] : memref<1x128xf32, #tpu.memory_space<vmem>>, vector<1x128xf32>
    %8 = vector.broadcast %7 : vector<1x128xf32> to vector<128x128xf32>
    %9 = arith.addf %6, %8 : vector<128x128xf32>
    %cst_10 = arith.constant 0.000000e+00 : f32
    %10 = vector.broadcast %cst_10 : f32 to vector<128x128xf32>
    %11 = arith.maximumf %9, %10 : vector<128x128xf32>
    %12 = arith.truncf %11 : vector<128x128xf32> to vector<128x128xbf16>
    %c0_11 = arith.constant 0 : index
    %c0_12 = arith.constant 0 : index
    %13 = vector.load %arg6[%c0_11, %c0_12] : memref<128x128xbf16, #tpu.memory_space<vmem>>, vector<128x128xbf16>
    %cst_13 = arith.constant dense<0.000000e+00> : vector<128x128xf32>
    %14 = tpu.matmul %12, %13, %cst_13 {dimension_numbers = #tpu.dot_dimension_numbers<[1], [0], [0], [1], [0, 0, 1, 1], [], []>} : vector<128x128xbf16>, vector<128x128xbf16>, vector<128x128xf32> -> vector<128x128xf32>
    %c0_14 = arith.constant 0 : index
    %c0_15 = arith.constant 0 : index
    %15 = vector.load %arg7[%c0_14, %c0_15] : memref<1x128xf32, #tpu.memory_space<vmem>>, vector<1x128xf32>
    %16 = vector.broadcast %15 : vector<1x128xf32> to vector<128x128xf32>
    %17 = arith.addf %14, %16 : vector<128x128xf32>
    %cst_16 = arith.constant 0.000000e+00 : f32
    %18 = vector.broadcast %cst_16 : f32 to vector<128x128xf32>
    %19 = arith.maximumf %17, %18 : vector<128x128xf32>
    %c0_17 = arith.constant 0 : index
    %c0_18 = arith.constant 0 : index
    %20 = vector.load %arg8[%c0_17, %c0_18] : memref<1x128xf32, #tpu.memory_space<vmem>>, vector<1x128xf32>
    %21 = vector.broadcast %20 : vector<1x128xf32> to vector<128x128xf32>
    %22 = arith.mulf %19, %21 : vector<128x128xf32>
    %cst_19 = arith.constant dense<0.000000e+00> : vector<128xf32>
    %23 = vector.multi_reduction <add>, %22, %cst_19 [1] : vector<128x128xf32> to vector<128xf32>
    %24 = vector.shape_cast %23 : vector<128xf32> to vector<128x1xf32>
    %c0_20 = arith.constant 0 : index
    %c0_21 = arith.constant 0 : index
    %25 = memref.load %arg9[%c0_20, %c0_21] : memref<1x1xf32, #tpu.memory_space<smem>>
    %26 = vector.broadcast %25 : f32 to vector<128x1xf32>
    %27 = arith.addf %24, %26 : vector<128x1xf32>
    %c0_22 = arith.constant 0 : index
    %c0_23 = arith.constant 0 : index
    %28 = vector.load %arg10[%c0_22, %c0_23] : memref<128x1xf32, #tpu.memory_space<vmem>>, vector<128x1xf32>
    tpu.vector_store %arg10[%c0_22, %c0_23], %27 {strides = array<i32>} : memref<128x1xf32, #tpu.memory_space<vmem>>, vector<128x1xf32>,
    return
  }
  func.func @transform_0(%arg0: i32) -> (i32, i32) {
    %c0_i32 = arith.constant 0 : i32
    %c0_i32_0 = arith.constant 0 : i32
    return %arg0, %c0_i32 : i32, i32
  }
  func.func @transform_1(%arg0: i32) -> (i32, i32) {
    %c0_i32 = arith.constant 0 : i32
    %c0_i32_0 = arith.constant 0 : i32
    return %arg0, %c0_i32 : i32, i32
  }
  func.func @transform_2(%arg0: i32) -> (i32, i32) {
    %c0_i32 = arith.constant 0 : i32
    %c0_i32_0 = arith.constant 0 : i32
    %c0_i32_1 = arith.constant 0 : i32
    return %c0_i32, %c0_i32_0 : i32, i32
  }
  func.func @transform_3(%arg0: i32) -> (i32, i32) {
    %c0_i32 = arith.constant 0 : i32
    %c0_i32_0 = arith.constant 0 : i32
    %c0_i32_1 = arith.constant 0 : i32
    return %c0_i32, %c0_i32_0 : i32, i32
  }
  func.func @transform_4(%arg0: i32) -> (i32, i32) {
    %c0_i32 = arith.constant 0 : i32
    %c0_i32_0 = arith.constant 0 : i32
    %c0_i32_1 = arith.constant 0 : i32
    return %c0_i32, %c0_i32_0 : i32, i32
  }
  func.func @transform_5(%arg0: i32) -> (i32, i32) {
    %c0_i32 = arith.constant 0 : i32
    %c0_i32_0 = arith.constant 0 : i32
    %c0_i32_1 = arith.constant 0 : i32
    return %c0_i32, %c0_i32_0 : i32, i32
  }
  func.func @transform_6(%arg0: i32) -> (i32, i32) {
    %c0_i32 = arith.constant 0 : i32
    %c0_i32_0 = arith.constant 0 : i32
    %c0_i32_1 = arith.constant 0 : i32
    return %c0_i32, %c0_i32_0 : i32, i32
  }
  func.func @transform_7(%arg0: i32) -> (i32, i32) {
    %c0_i32 = arith.constant 0 : i32
    %c0_i32_0 = arith.constant 0 : i32
    %c0_i32_1 = arith.constant 0 : i32
    return %c0_i32, %c0_i32_0 : i32, i32
  }
  func.func @transform_8(%arg0: i32) -> (i32, i32) {
    %c0_i32 = arith.constant 0 : i32
    %c0_i32_0 = arith.constant 0 : i32
    %c0_i32_1 = arith.constant 0 : i32
    return %c0_i32, %c0_i32_0 : i32, i32
  }
  func.func @transform_9(%arg0: i32) -> (i32, i32) {
    %c0_i32 = arith.constant 0 : i32
    %c0_i32_0 = arith.constant 0 : i32
    return %arg0, %c0_i32 : i32, i32
  }
}

</mosaic_0001>

<bundles_post_ra>
// kernel: tpu_custom_call.1
= control target key start
LH: loop header
LB: loop body
LE: loop exit
PB: predicated region body
PF: predicated region fallthrough
CT: control target
= control target key end

     0   :  { %s1401_s11 = smov 0   ;;  %s1577_s0 = inlined_call_operand.vmem [shape: bf16[256,24], index: 0, kind: input, shape index: {}]   ;;  %s1578_s1 = inlined_call_operand.vmem [shape: bf16[256,8], index: 1, kind: input, shape index: {}]   ;;  %s1579_s2 = inlined_call_operand.vmem [shape: bf16[24,128], index: 2, kind: input, shape index: {}]   ;;  %s1580_s3 = inlined_call_operand.vmem [shape: bf16[8,128], index: 3, kind: input, shape index: {}]   ;;  %s1581_s4 = inlined_call_operand.vmem [shape: f32[1,128], index: 4, kind: input, shape index: {}]   ;;  %s1582_s5 = inlined_call_operand.vmem [shape: bf16[128,128], index: 5, kind: input, shape index: {}]   ;;  %s1583_s6 = inlined_call_operand.vmem [shape: f32[1,128], index: 6, kind: input, shape index: {}]   ;;  %s1584_s7 = inlined_call_operand.vmem [shape: f32[1,128], index: 7, kind: input, shape index: {}]   ;;  %s1585_s8 = inlined_call_operand.<no memory space> [shape: f32[1,1], index: 8, kind: input, shape index: {}]   ;;  %s1586_s9 = inlined_call_operand.vmem [shape: f32[256,1], index: 9, kind: output, shape index: {}]  }
   0x1   :  { %14 = sst [smem:[#allocation2]] %s1585_s8 }
   0x2 LB: > { %s1125_s12 = sadd.s32 4294967295, %s1346_s11   ;;  %p1129_p0 = scmp.ge.s32.totalorder %s1346_s11, 1  ;;  %s1346_s11 = sphi %s1401_s11, %s20_s11  }
   0x3   : > { %p300_p1 = scmp.lt.s32.totalorder %s1346_s11, 3 }
   0x5   : > { %p301_p2 = pnand %p1129_p0, %p300_p1 }
   0x6   : > { %v395_v0 = vld [vmem:[%s1580_s3] sm:$0xf] (!%p301_p2)  ;;  %vm461_vm0 = vcmask (!%p301_p2), 1043456   ;;  %s1130_s8 = sshll.u32 (!%p301_p2), %s1125_s12, 4  ;;  %v1333_v4 = vld [vmem:[%s1582_s5 + $0x8] sm:$0xff] (!%p301_p2)   ;;  %vm436_vm1 = vcmask (!%p301_p2), 64512  }
   0x7   : > { %304 = sbr.rel (%p301_p2) target bundleno = 667 (0x29b), region = 56  ;;  %v1315_v1 = vld [vmem:[%s1579_s2] sm:$0xff] (!%p301_p2)   ;;  %1304 = vmatprep.subr.msk.bf16.mxu0 (!%p301_p2), %vm461_vm0, %v395_v0  ;;  %v463_v2 = vsel (!%p301_p2), %vm461_vm0, %v395_v0, 0  ;;  %p342_p3 = scmp.lt.s32.totalorder (!%p301_p2), %s1130_s8, 31  ;;  %v1334_v5 = vld [vmem:[%s1582_s5 + $0x10] sm:$0xff] (!%p301_p2)   ;;  %v1335_v10 = vld [vmem:[%s1582_s5 + $0x18] sm:$0xff] (!%p301_p2)  }
   0x8   : > { %1219 = vmatpush3.bf16.msra.mxu0 (!%p301_p2), %v463_v2  ;;  %v1332_v3 = vld [vmem:[%s1582_s5] sm:$0xff] (!%p301_p2)   ;;  %v1320_v6 = vld [vmem:[%s1579_s2 + $0x8] ss:$0 sps:$4 sm:$0xff] (!%p301_p2)   ;;  %vm611_vm2 = vcmask (!%p301_p2), 195584   ;;  %v1338_v27 = vld [vmem:[%s1582_s5 + $0x30] sm:$0xff] (!%p301_p2)   ;;  %s1022_s28 = sld [smem:[#allocation2]] (!%p301_p2) }
   0x9   : > { %1236 = vmatprep.subr.bf16.mxu0 (!%p301_p2), %v1315_v1  ;;  %1256 = vmatprep.subr.bf16.mxu1 (!%p301_p2), %v1332_v3  ;;  %v637_v11 = vsel (!%p301_p2), %vm461_vm0, %v1320_v6, 0  ;;  %v1336_v16 = vld [vmem:[%s1582_s5 + $0x20] sm:$0xff] (!%p301_p2)   ;;  %v1337_v17 = vld [vmem:[%s1582_s5 + $0x28] sm:$0xff] (!%p301_p2)   ;;  %v1339_v28 = vld [vmem:[%s1582_s5 + $0x38] sm:$0xff] (!%p301_p2)   ;;  %vm1040_vm3 = vcmask (!%p301_p2), 7168  }
   0xa   : > { %1257 = vmatpush3.bf16.msra.mxu1 (!%p301_p2), %v1332_v3  ;;  %v1170_v29 = vld [vmem:[%s1581_s4] ss:$0 sm:$0xff] (!%p301_p2) }
   0xb   : > { %1258 = vmatprep.subr.bf16.mxu1 (!%p301_p2), %v1333_v4 }
   0xe   : > { %s1588_s8 = smov (!%p342_p3, %s1130_s8), 31  ;;  %1259 = vmatpush3.bf16.msra.mxu1 %v1333_v4 }
   0xf   : > { %s1131_s21 = sshll.u32 %s1588_s8, 2  ;;  %1260 = vmatprep.subr.bf16.mxu1 %v1334_v5  ;;  %s1135_s29 = sshll.u32 %s1588_s8, 3 }
  0x10   : > { %s1432_s26 = scalar_lea.vmem %s1578_s1, %s1131_s21  ;;  %s1451_s13 = scalar_lea.vmem %s1577_s0, %s1131_s21 }
  0x11   : > { %v1314_v7 = vld [vmem:[%s1432_s26] sm:$0xff]   ;;  %v1316_v8 = vld [vmem:[%s1432_s26 + $0x8] sm:$0xff]   ;;  %v1317_v9 = vld [vmem:[%s1432_s26 + $0x10] sm:$0xff]   ;;  %s1540_s12 = scalar_lea.vmem %s1586_s9, %s1135_s29 }
  0x12   : > { %1220 = vmatprep.mubr.msk.bf16.mxu0 %vm436_vm1, %v1314_v7  ;;  %1261 = vmatpush3.bf16.msra.mxu1 %v1334_v5  ;;  %v1318_v12 = vld [vmem:[%s1432_s26 + $0x18] sm:$0xff]   ;;  %v1319_v13 = vld [vmem:[%s1432_s26 + $0x20] sm:$0xff]   ;;  %v1321_v14 = vld [vmem:[%s1432_s26 + $0x28] sm:$0xff]  }
  0x13   : > { %1221 = vmatmul.mubr.msk.bf16.vlgmr.msra.gmra.mrb[0].mxu0 %vm436_vm1, %v1316_v8  ;;  %1262 = vmatprep.subr.bf16.mxu1 %v1335_v10  ;;  %v1322_v15 = vld [vmem:[%s1432_s26 + $0x30] sm:$0xff]   ;;  %v1323_v18 = vld [vmem:[%s1432_s26 + $0x38] sm:$0xff]   ;;  %v1324_v19 = vld [vmem:[%s1451_s13] sm:$0xff]  }
  0x14   : > { %1237 = vmatpush3.bf16.msra.mxu0 %v1315_v1  ;;  %1224 = vmatprep.mubr.msk.bf16.mxu0 %vm436_vm1, %v1317_v9  ;;  %v1325_v20 = vld [vmem:[%s1451_s13 + $0x8] sm:$0xff]   ;;  %v1326_v21 = vld [vmem:[%s1451_s13 + $0x10] sm:$0xff]   ;;  %v1327_v22 = vld [vmem:[%s1451_s13 + $0x18] sm:$0xff]  }
  0x15   : > { %1305 = vmatprep.subr.msk.bf16.mxu0 %vm461_vm0, %v1320_v6  ;;  %v1328_v23 = vld [vmem:[%s1451_s13 + $0x20] sm:$0xff]   ;;  %v1329_v24 = vld [vmem:[%s1451_s13 + $0x28] sm:$0xff]   ;;  %v1330_v25 = vld [vmem:[%s1451_s13 + $0x30] sm:$0xff]  }
  0x16   : > { %1263 = vmatpush3.bf16.msra.mxu1 %v1335_v10  ;;  %v1331_v26 = vld [vmem:[%s1451_s13 + $0x38] sm:$0xff]  }
  0x17   : > { %1264 = vmatprep.subr.bf16.mxu1 %v1336_v16 }
  0x18   : > { %1239 = vmatpush3.bf16.msra.mxu0 %v637_v11 }
  0x1a   : > { %1265 = vmatpush3.bf16.msra.mxu1 %v1336_v16 }
  0x1b   : > { %1225 = vmatmul.mubr.msk.bf16.gmra.mrb[4].mxu0 %vm436_vm1, %v1318_v12  ;;  %1266 = vmatprep.subr.bf16.mxu1 %v1337_v17 }
  0x1c   : > { %1228 = vmatprep.mubr.msk.bf16.mxu0 %vm436_vm1, %v1319_v13 }
  0x1e   : > { %1267 = vmatpush3.bf16.msra.mxu1 %v1337_v17 }
  0x1f   : > { %1268 = vmatprep.subr.bf16.mxu1 %v1338_v27 }
  0x22   : > { %1269 = vmatpush3.bf16.msra.mxu1 %v1338_v27 }
  0x23   : > { %1229 = vmatmul.mubr.msk.bf16.gmra.mrb[8].mxu0 %vm436_vm1, %v1321_v14  ;;  %1270 = vmatprep.subr.bf16.mxu1 %v1339_v28 }
  0x24   : > { %1232 = vmatprep.mubr.msk.bf16.mxu0 %vm436_vm1, %v1322_v15 }
  0x26   : > { %1271 = vmatpush3.bf16.msra.mxu1 %v1339_v28  ;;  %v1504_v28 = vld [vmem:[%s1584_s7] ss:$0 sm:$0xff] }
  0x2b   : > { %1233 = vmatmul.mubr.msk.bf16.gmra.mrb[12].mxu0 %vm436_vm1, %v1323_v18 }
  0x2c   : > { %1240 = vmatprep.mubr.msk.bf16.mxu0 %vm611_vm2, %v1324_v19 }
  0x33   : > { %1241 = vmatmul.mubr.msk.bf16.vlgmr.msra.gmra.mrb[0].mxu0 %vm611_vm2, %v1325_v20 }
  0x34   : > { %1244 = vmatprep.mubr.msk.bf16.mxu0 %vm611_vm2, %v1326_v21 }
  0x3b   : > { %1245 = vmatmul.mubr.msk.bf16.gmra.mrb[4].mxu0 %vm611_vm2, %v1327_v22  ;;  %v1497_v22 = vld [vmem:[%s1583_s6] ss:$0 sm:$0xff] }
  0x3c   : > { %1248 = vmatprep.mubr.msk.bf16.mxu0 %vm611_vm2, %v1328_v23 }
  0x43   : > { %1249 = vmatmul.mubr.msk.bf16.gmra.mrb[8].mxu0 %vm611_vm2, %v1329_v24 }
  0x44   : > { %1252 = vmatprep.mubr.msk.bf16.mxu0 %vm611_vm2, %v1330_v25 }
  0x4b   : > { %1253 = vmatmul.mubr.msk.bf16.gmra.mrb[12].mxu0 %vm611_vm2, %v1331_v26 }
 0x106   : > { %v1242_v30 = vpop.f32.mrb[0].mxu0 }
 0x107   : > { %v745_v31 = vadd.f32 %v1242_v30, %v1170_v29  ;;  %v673_v32 = vpop.f32.mrb[1].mxu0 }
 0x108   : > { %v743_v33 = vadd.f32 %v1170_v29, %v673_v32  ;;  %v1243_v34 = vpop.f32.mrb[2].mxu0 }
 0x109   : > { %v746_v35 = vadd.f32 %v1243_v34, %v1170_v29  ;;  %v676_v36 = vpop.f32.mrb[3].mxu0  ;;  %v761_v38 = vmax.f32 %v745_v31, 0.0 }
 0x10a   : > { %v744_v37 = vadd.f32 %v1170_v29, %v676_v36  ;;  %v759_v40 = vmax.f32 %v743_v33, 0.0 }
 0x10b   : > { %v762_v39 = vmax.f32 %v746_v35, 0.0 }
 0x10c   : > { %v760_v41 = vmax.f32 %v744_v37, 0.0 }
 0x10d   : > { %v776_v42 = vpack.c.bf16 %v762_v39, %v761_v38 }
 0x10e   : > { %v1246_v43 = vpop.f32.mrb[4].mxu0  ;;  %v775_v44 = vpack.c.bf16 %v760_v41, %v759_v40 }
 0x10f   : > { %v749_v45 = vadd.f32 %v1246_v43, %v1170_v29  ;;  %v689_v46 = vpop.f32.mrb[5].mxu0 }
 0x110   : > { %v747_v47 = vadd.f32 %v1170_v29, %v689_v46  ;;  %v1247_v48 = vpop.f32.mrb[6].mxu0  ;;  %1272 = vmatprep.mubr.bf16.mxu1 %v775_v44 }
 0x111   : > { %v750_v49 = vadd.f32 %v1247_v48, %v1170_v29  ;;  %v692_v50 = vpop.f32.mrb[7].mxu0  ;;  %1273 = vmatmul.mubr.bf16.vlgmr.msra.gmra.mrb[0].mxu1 %v776_v42  ;;  %v765_v52 = vmax.f32 %v749_v45, 0.0 }
 0x112   : > { %v748_v51 = vadd.f32 %v1170_v29, %v692_v50  ;;  %v763_v54 = vmax.f32 %v747_v47, 0.0 }
 0x113   : > { %v766_v53 = vmax.f32 %v750_v49, 0.0 }
 0x114   : > { %v764_v55 = vmax.f32 %v748_v51, 0.0 }
 0x115   : > { %v778_v56 = vpack.c.bf16 %v766_v53, %v765_v52 }
 0x116   : > { %v777_v57 = vpack.c.bf16 %v764_v55, %v763_v54  ;;  %v1250_v58 = vpop.f32.mrb[8].mxu0 }
 0x117   : > { %v753_v59 = vadd.f32 %v1250_v58, %v1170_v29  ;;  %v705_v60 = vpop.f32.mrb[9].mxu0 }
 0x118   : > { %v751_v61 = vadd.f32 %v1170_v29, %v705_v60  ;;  %v1251_v62 = vpop.f32.mrb[10].mxu0  ;;  %1276 = vmatprep.mubr.bf16.mxu1 %v777_v57 }
 0x119   : > { %v754_v63 = vadd.f32 %v1251_v62, %v1170_v29  ;;  %v708_v0 = vpop.f32.mrb[11].mxu0  ;;  %1277 = vmatmul.mubr.bf16.gmra.mrb[4].mxu1 %v778_v56  ;;  %v769_v2 = vmax.f32 %v753_v59, 0.0 }
 0x11a   : > { %v752_v1 = vadd.f32 %v1170_v29, %v708_v0  ;;  %v767_v4 = vmax.f32 %v751_v61, 0.0 }
 0x11b   : > { %v770_v3 = vmax.f32 %v754_v63, 0.0 }
 0x11c   : > { %v768_v5 = vmax.f32 %v752_v1, 0.0 }
 0x11d   : > { %v780_v6 = vpack.c.bf16 %v770_v3, %v769_v2 }
 0x11e   : > { %v779_v7 = vpack.c.bf16 %v768_v5, %v767_v4  ;;  %v1254_v8 = vpop.f32.mrb[12].mxu0 }
 0x11f   : > { %v757_v9 = vadd.f32 %v1254_v8, %v1170_v29  ;;  %v721_v10 = vpop.f32.mrb[13].mxu0 }
 0x120   : > { %v755_v11 = vadd.f32 %v1170_v29, %v721_v10  ;;  %v1255_v12 = vpop.f32.mrb[14].mxu0  ;;  %1280 = vmatprep.mubr.bf16.mxu1 %v779_v7 }
 0x121   : > { %v758_v13 = vadd.f32 %v1255_v12, %v1170_v29  ;;  %v724_v14 = vpop.f32.mrb[15].mxu0  ;;  %1281 = vmatmul.mubr.bf16.gmra.mrb[8].mxu1 %v780_v6  ;;  %v773_v16 = vmax.f32 %v757_v9, 0.0 }
 0x122   : > { %v756_v15 = vadd.f32 %v1170_v29, %v724_v14  ;;  %v771_v18 = vmax.f32 %v755_v11, 0.0 }
 0x123   : > { %v774_v17 = vmax.f32 %v758_v13, 0.0 }
 0x124   : > { %v772_v19 = vmax.f32 %v756_v15, 0.0 }
 0x125   : > { %v782_v20 = vpack.c.bf16 %v774_v17, %v773_v16 }
 0x126   : > { %v781_v21 = vpack.c.bf16 %v772_v19, %v771_v18 }
 0x128   : > { %1284 = vmatprep.mubr.bf16.mxu1 %v781_v21 }
 0x129   : > { %1285 = vmatmul.mubr.bf16.gmra.mrb[12].mxu1 %v782_v20 }
 0x1e4   : > { %v1274_v23 = vpop.f32.mrb[0].mxu1 }
 0x1e5   : > { %v897_v24 = vadd.f32 %v1274_v23, %v1497_v22  ;;  %v888_v25 = vpop.f32.mrb[1].mxu1 }
 0x1e6   : > { %v889_v26 = vadd.f32 %v1497_v22, %v888_v25  ;;  %v1275_v27 = vpop.f32.mrb[2].mxu1 }
 0x1e7   : > { %v953_v29 = vmax.f32 %v897_v24, 0.0  ;;  %v900_v30 = vadd.f32 %v1275_v27, %v1497_v22  ;;  %v891_v31 = vpop.f32.mrb[3].mxu1 }
 0x1e8   : > { %v951_v32 = vmax.f32 %v889_v26, 0.0  ;;  %v892_v33 = vadd.f32 %v1497_v22, %v891_v31 }
 0x1e9   : > { %v954_v34 = vmax.f32 %v900_v30, 0.0  ;;  %v976_v35 = vmul.f32 %v1504_v28, %v953_v29 }
 0x1ea   : > { %v952_v36 = vmax.f32 %v892_v33, 0.0  ;;  %v974_v37 = vmul.f32 %v1504_v28, %v951_v32 }
 0x1eb   : > { %994 = vadd.xlane.f32.xlu1 %v976_v35  ;;  %v977_v41 = vmul.f32 %v1504_v28, %v954_v34 }
 0x1ec   : > { %990 = vadd.xlane.f32.xlu0 %v974_v37  ;;  %v1278_v38 = vpop.f32.mrb[4].mxu1  ;;  %v975_v44 = vmul.f32 %v1504_v28, %v952_v36 }
 0x1ed   : > { %v913_v39 = vadd.f32 %v1278_v38, %v1497_v22  ;;  %v904_v40 = vpop.f32.mrb[5].mxu1 }
 0x1ee   : > { %v905_v42 = vadd.f32 %v1497_v22, %v904_v40  ;;  %v1279_v43 = vpop.f32.mrb[6].mxu1 }
 0x1ef   : > { %v957_v45 = vmax.f32 %v913_v39, 0.0  ;;  %v916_v46 = vadd.f32 %v1279_v43, %v1497_v22  ;;  %996 = vadd.xlane.f32.xlu1 %v977_v41  ;;  %v907_v47 = vpop.f32.mrb[7].mxu1 }
 0x1f0   : > { %v908_v48 = vadd.f32 %v1497_v22, %v907_v47  ;;  %992 = vadd.xlane.f32.xlu0 %v975_v44  ;;  %v955_v51 = vmax.f32 %v905_v42, 0.0 }
 0x1f1   : > { %v958_v49 = vmax.f32 %v916_v46, 0.0  ;;  %v980_v50 = vmul.f32 %v1504_v28, %v957_v45 }
 0x1f2   : > { %v956_v52 = vmax.f32 %v908_v48, 0.0  ;;  %v978_v59 = vmul.f32 %v1504_v28, %v955_v51 }
 0x1f3   : > { %v981_v53 = vmul.f32 %v1504_v28, %v958_v49 }
 0x1f4   : > { %1002 = vadd.xlane.f32.xlu0 %v980_v50  ;;  %v1282_v54 = vpop.f32.mrb[8].mxu1  ;;  %v979_v63 = vmul.f32 %v1504_v28, %v956_v52 }
 0x1f5   : > { %v929_v55 = vadd.f32 %v1282_v54, %v1497_v22  ;;  %1004 = vadd.xlane.f32.xlu1 %v981_v53  ;;  %v920_v56 = vpop.f32.mrb[9].mxu1 }
 0x1f6   : > { %v921_v57 = vadd.f32 %v1497_v22, %v920_v56  ;;  %v1283_v58 = vpop.f32.mrb[10].mxu1 }
 0x1f7   : > { %v961_v60 = vmax.f32 %v929_v55, 0.0  ;;  %v932_v61 = vadd.f32 %v1283_v58, %v1497_v22  ;;  %v923_v62 = vpop.f32.mrb[11].mxu1 }
 0x1f8   : > { %v924_v0 = vadd.f32 %v1497_v22, %v923_v62  ;;  %998 = vadd.xlane.f32.xlu0 %v978_v59  ;;  %v959_v3 = vmax.f32 %v921_v57, 0.0 }
 0x1f9   : > { %v962_v1 = vmax.f32 %v932_v61, 0.0  ;;  %1000 = vadd.xlane.f32.xlu1 %v979_v63  ;;  %v984_v2 = vmul.f32 %v1504_v28, %v961_v60 }
 0x1fa   : > { %v960_v4 = vmax.f32 %v924_v0, 0.0  ;;  %v982_v11 = vmul.f32 %v1504_v28, %v959_v3 }
 0x1fb   : > { %v985_v5 = vmul.f32 %v1504_v28, %v962_v1 }
 0x1fc   : > { %1010 = vadd.xlane.f32.xlu0 %v984_v2  ;;  %v1286_v6 = vpop.f32.mrb[12].mxu1  ;;  %v983_v13 = vmul.f32 %v1504_v28, %v960_v4 }
 0x1fd   : > { %1012 = vadd.xlane.f32.xlu1 %v985_v5  ;;  %v936_v7 = vpop.f32.mrb[13].mxu1  ;;  %v945_v8 = vadd.f32 %v1286_v6, %v1497_v22 }
 0x1fe   : > { %v937_v9 = vadd.f32 %v1497_v22, %v936_v7  ;;  %v1287_v10 = vpop.f32.mrb[14].mxu1 }
 0x1ff   : > { %v939_v12 = vpop.f32.mrb[15].mxu1  ;;  %v948_v15 = vadd.f32 %v1287_v10, %v1497_v22  ;;  %v965_v17 = vmax.f32 %v945_v8, 0.0 }
 0x200   : > { %v963_v14 = vmax.f32 %v937_v9, 0.0  ;;  %v940_v16 = vadd.f32 %v1497_v22, %v939_v12  ;;  %1006 = vadd.xlane.f32.xlu0 %v982_v11  ;;  %v1023_v22 = vstv %s1022_s28 }
 0x201   : > { %1008 = vadd.xlane.f32.xlu1 %v983_v13  ;;  %v966_v20 = vmax.f32 %v948_v15, 0.0  ;;  %v988_v23 = vmul.f32 %v1504_v28, %v965_v17 }
 0x202   : > { %v964_v18 = vmax.f32 %v940_v16, 0.0  ;;  %v986_v19 = vmul.f32 %v1504_v28, %v963_v14 }
 0x203   : > { %v989_v24 = vmul.f32 %v1504_v28, %v966_v20 }
 0x204   : > { %1014 = vadd.xlane.f32.xlu0 %v986_v19  ;;  %v987_v21 = vmul.f32 %v1504_v28, %v964_v18 }
 0x206   : > { %1016 = vadd.xlane.f32.xlu1 %v987_v21 }
 0x208   : > { %1018 = vadd.xlane.f32.xlu0 %v988_v23 }
 0x20a   : > { %1020 = vadd.xlane.f32.xlu1 %v989_v24 }
 0x278   : > { %v995_v25 = vpop.xlane.xlu1 %994 }
 0x279   : > { %v1026_v26 = vadd.f32 %v1023_v22, %v995_v25  ;;  %v991_v27 = vpop.xlane.xlu0 %990 }
 0x27a   : > { %v1024_v28 = vadd.f32 %v1023_v22, %v991_v27 }
 0x27b   : > { %1043 = vst.msk [vmem:[%s1540_s12 + $0x10] sm:$0xff] %vm1040_vm3, %v1026_v26 }
 0x27c   : > { %1041 = vst.msk [vmem:[%s1540_s12] sm:$0xff] %vm1040_vm3, %v1024_v28  ;;  %v997_v29 = vpop.xlane.xlu1 %996 }
 0x27d   : > { %v1027_v30 = vadd.f32 %v1023_v22, %v997_v29  ;;  %v993_v31 = vpop.xlane.xlu0 %992 }
 0x27e   : > { %v1025_v32 = vadd.f32 %v1023_v22, %v993_v31 }
 0x27f   : > { %1044 = vst.msk [vmem:[%s1540_s12 + $0x18] sm:$0xff] %vm1040_vm3, %v1027_v30 }
 0x280   : > { %1042 = vst.msk [vmem:[%s1540_s12 + $0x8] sm:$0xff] %vm1040_vm3, %v1025_v32 }
 0x281   : > { %v1003_v33 = vpop.xlane.xlu0 %1002 }
 0x282   : > { %v1030_v34 = vadd.f32 %v1023_v22, %v1003_v33  ;;  %v1005_v35 = vpop.xlane.xlu1 %1004 }
 0x283   : > { %v1031_v36 = vadd.f32 %v1023_v22, %v1005_v35 }
 0x284   : > { %1047 = vst.msk [vmem:[%s1540_s12 + $0x30] sm:$0xff] %vm1040_vm3, %v1030_v34 }
 0x285   : > { %1048 = vst.msk [vmem:[%s1540_s12 + $0x38] sm:$0xff] %vm1040_vm3, %v1031_v36  ;;  %v999_v37 = vpop.xlane.xlu0 %998 }
 0x286   : > { %v1028_v38 = vadd.f32 %v1023_v22, %v999_v37  ;;  %v1001_v39 = vpop.xlane.xlu1 %1000 }
 0x287   : > { %v1029_v40 = vadd.f32 %v1023_v22, %v1001_v39 }
 0x288   : > { %1045 = vst.msk [vmem:[%s1540_s12 + $0x20] sm:$0xff] %vm1040_vm3, %v1028_v38 }
 0x289   : > { %1046 = vst.msk [vmem:[%s1540_s12 + $0x28] sm:$0xff] %vm1040_vm3, %v1029_v40  ;;  %v1011_v41 = vpop.xlane.xlu0 %1010 }
 0x28a   : > { %v1034_v42 = vadd.f32 %v1023_v22, %v1011_v41  ;;  %v1013_v43 = vpop.xlane.xlu1 %1012 }
 0x28b   : > { %v1035_v44 = vadd.f32 %v1023_v22, %v1013_v43 }
 0x28c   : > { %1051 = vst.msk [vmem:[%s1540_s12 + $0x50] sm:$0xff] %vm1040_vm3, %v1034_v42 }
 0x28d   : > { %1052 = vst.msk [vmem:[%s1540_s12 + $0x58] sm:$0xff] %vm1040_vm3, %v1035_v44  ;;  %v1007_v45 = vpop.xlane.xlu0 %1006 }
 0x28e   : > { %v1032_v46 = vadd.f32 %v1023_v22, %v1007_v45  ;;  %v1009_v47 = vpop.xlane.xlu1 %1008 }
 0x28f   : > { %v1033_v48 = vadd.f32 %v1023_v22, %v1009_v47 }
 0x290   : > { %1049 = vst.msk [vmem:[%s1540_s12 + $0x40] sm:$0xff] %vm1040_vm3, %v1032_v46 }
 0x291   : > { %1050 = vst.msk [vmem:[%s1540_s12 + $0x48] sm:$0xff] %vm1040_vm3, %v1033_v48  ;;  %v1015_v49 = vpop.xlane.xlu0 %1014 }
 0x292   : > { %v1036_v50 = vadd.f32 %v1023_v22, %v1015_v49 }
 0x293   : > { %v1017_v51 = vpop.xlane.xlu1 %1016 }
 0x294   : > { %1053 = vst.msk [vmem:[%s1540_s12 + $0x60] sm:$0xff] %vm1040_vm3, %v1036_v50  ;;  %v1037_v52 = vadd.f32 %v1023_v22, %v1017_v51 }
 0x295   : > { %v1019_v53 = vpop.xlane.xlu0 %1018 }
 0x296   : > { %1054 = vst.msk [vmem:[%s1540_s12 + $0x68] sm:$0xff] %vm1040_vm3, %v1037_v52  ;;  %v1038_v54 = vadd.f32 %v1023_v22, %v1019_v53 }
 0x297   : > { %v1021_v55 = vpop.xlane.xlu1 %1020 }
 0x298   : > { %1055 = vst.msk [vmem:[%s1540_s12 + $0x70] sm:$0xff] %vm1040_vm3, %v1038_v54  ;;  %v1039_v56 = vadd.f32 %v1023_v22, %v1021_v55 }
 0x29a   : > { %1056 = vst.msk [vmem:[%s1540_s12 + $0x78] sm:$0xff] %vm1040_vm3, %v1039_v56 }
 0x29b PF: > { %s20_s11 = sadd.s32 1, %s1346_s11  }
 0x29c   : > { %p17_p4 = scmp.ge.s32.totalorder %s20_s11, 4  }
 0x29e   :  { %19 = sbr.rel (!%p17_p4) target bundleno = 2 (0x2), region = 89 }

</bundles_post_ra>
